<compile_context>
chip_gen: v7x
topology: tpu7x:2x2x1
jax: 0.10.0
libtpu: 0.0.40
codegen_flags: <defaults>
</compile_context>

<pallas_src>
import math

import jax
import jax.numpy as jnp
from jax.experimental import pallas as pl
from jax.experimental.pallas import tpu as pltpu


def _round_up(x: int, m: int) -> int:
    return ((x + m - 1) // m) * m


def _scale_kernel(x_ref, w_ref, o_ref):
    # x_ref: (Bt, TS, 1)  per-(batch, substructure) scales
    # w_ref: (TS, TD)     weight tile (resident across the inner batch axis)
    # o_ref: (Bt, TS, TD)
    x = x_ref[...].astype(o_ref.dtype)
    w = w_ref[...].astype(o_ref.dtype)
    o_ref[...] = x * w[None, :, :]


def matrix_scale_embedding(
    x: jax.Array,
    layers: jax.Array,
    *,
    max_bt: int = 8,
    block_budget_bytes: int = 12 * 1024 * 1024,
    max_ts=None,
    max_td=None,
) -> jax.Array:
    """x: (B, S, 1), layers: (S, D) -> (B, S, D).  out[b,s,d] = x[b,s,0]*layers[s,d]."""
    B, S, one = x.shape
    assert one == 1, "x must have trailing singleton dim"
    S_w, D = layers.shape
    assert S_w == S, "seq_len must equal n_substructures"

    # Output/compute dtype follows torch type promotion of `x * layers`.
    out_dtype = jnp.result_type(x.dtype, layers.dtype)
    iso = jnp.dtype(out_dtype).itemsize
    isw = jnp.dtype(layers.dtype).itemsize
    isx = jnp.dtype(x.dtype).itemsize

    # dtype-aware sublane unit: 8 rows for 32-bit, 16 for bf16, 32 for 8-bit.
    sub = max(8, 32 // min(iso, isw, isx))

    # ---- tile selection (cdiv-based; boundary tiles masked by Pallas) -------
    Bt = min(B, max_bt)

    def block_bytes(ts: int, td: int) -> int:
        """VMEM bytes for one buffer of each stream at tile (ts, td)."""
        tsp = _round_up(ts, 8)
        tdp = _round_up(td, 128)
        out_b = Bt * tsp * tdp * iso
        w_b = tsp * tdp * isw
        x_b = Bt * tsp * 128 * isx  # trailing dim 1 is lane-padded in VMEM
        return out_b + w_b + x_b

    # Feature tile: prefer full width D (contiguous output rows, fewest grid
    # steps); otherwise the largest multiple of 128 that fits the budget.
    if D <= 128 or block_bytes(sub, D) <= block_budget_bytes:
        TD = D
    else:
        avail = block_budget_bytes // sub - Bt * 128 * isx
        TD = max(128, (avail // (Bt * iso + isw)) // 128 * 128)
    if max_td is not None and max_td < TD and D > 128:
        TD = max(128, (max_td // 128) * 128)

    # Substructure tile: as large as the per-buffer budget allows.
    tdp = _round_up(TD, 128)
    per_row = tdp * (Bt * iso + isw) + Bt * 128 * isx
    TS = max(sub, (block_budget_bytes // per_row) // sub * sub)
    if max_ts is not None and max_ts < TS:
        TS = max(sub, (max_ts // sub) * sub)
    if TS >= S:
        TS = S  # full-dim block (exempt from the 8-row divisibility rule)

    # v7x has 2 TensorCores: if the grid degenerates to a single block, split
    # along S (or D) so a parallel axis has >= 2 blocks to shard across cores.
    if pl.cdiv(S, TS) * pl.cdiv(D, TD) * pl.cdiv(B, Bt) == 1:
        if S >= 2 * sub:
            TS = _round_up(-(-S // 2), sub)
        elif D >= 256:
            TD = _round_up(-(-D // 2), 128)

    grid = (pl.cdiv(S, TS), pl.cdiv(D, TD), pl.cdiv(B, Bt))

    grid_spec = pltpu.PrefetchScalarGridSpec(
        num_scalar_prefetch=0,
        grid=grid,
        in_specs=[
            # x tile aligned with the output block (tiny per-step DMA).
            pl.BlockSpec((Bt, TS, 1), lambda si, di, bi: (bi, si, 0)),
            # layers tile: independent of the inner batch axis -> stays resident
            # in VMEM, weights read from HBM once per (si, di).
            pl.BlockSpec((TS, TD), lambda si, di, bi: (si, di)),
        ],
        out_specs=pl.BlockSpec((Bt, TS, TD), lambda si, di, bi: (bi, si, di)),
    )

    # Double-buffered streams + headroom; capped well below v7x's 64 MiB VMEM.
    needed = 2 * block_bytes(TS, TD)
    vmem_limit = min(48 * 1024 * 1024, max(32 * 1024 * 1024, needed + 8 * 1024 * 1024))

    cost = pl.CostEstimate(
        flops=int(B) * int(S) * int(D),
        transcendentals=0,
        bytes_accessed=int(B * S * isx + S * D * isw + B * S * D * iso),
    )

    return pl.pallas_call(
        _scale_kernel,
        out_shape=jax.ShapeDtypeStruct((B, S, D), out_dtype),
        grid_spec=grid_spec,
        compiler_params=pltpu.CompilerParams(
            dimension_semantics=("parallel", "parallel", "parallel"),
            vmem_limit_bytes=int(vmem_limit),
        ),
        cost_estimate=cost,
    )(x, layers)


def init_layers(key, n_substructures: int, d_model: int) -> jax.Array:
    """xavier_uniform on a (n_substructures, d_model) tensor, matching torch."""
    bound = math.sqrt(6.0 / (n_substructures + d_model))
    return jax.random.uniform(
        key, (n_substructures, d_model), jnp.float32, minval=-bound, maxval=bound
    )


if __name__ == "__main__":
    key = jax.random.PRNGKey(0)
    k_w, k_x, k_w2, k_x2 = jax.random.split(key, 4)

    # Test 1: small shapes consistent with the module (batch=2, seq=16, d_model=32).
    B, S, D = 2, 16, 32
    layers = init_layers(k_w, S, D)                      # (S, D)
    x = jax.random.normal(k_x, (B, S, 1), jnp.float32)   # (B, S, 1)
    out = jax.block_until_ready(matrix_scale_embedding(x, layers))
    ref = x * layers[None, :, :]
    assert out.shape == (B, S, D) and out.dtype == ref.dtype
    assert jnp.allclose(out, ref, atol=1e-6), "mismatch vs reference (test 1)"

    # Test 2: multi-tile path with boundary masking on every axis (B=3 not a
    # multiple of Bt, S=30 not a multiple of 8, D=200 not a multiple of 128),
    # grid=(2,2,2), weight tile resident across the inner batch axis.
    B2, S2, D2 = 3, 30, 200
    layers2 = init_layers(k_w2, S2, D2)
    x2 = jax.random.normal(k_x2, (B2, S2, 1), jnp.float32)
    out2 = jax.block_until_ready(
        matrix_scale_embedding(x2, layers2, max_bt=2, max_ts=16, max_td=128)
    )
    ref2 = x2 * layers2[None, :, :]
    assert out2.shape == (B2, S2, D2)
    assert jnp.allclose(out2, ref2, atol=1e-6), "mismatch vs reference (test 2)"

    print("KERNEL_OK")
</pallas_src>

<mosaic_0001>
module attributes {stable_mosaic.version = 11 : i64} {
  func.func @_scale_kernel(%arg0: i32, %arg1: i32, %arg2: i32, %arg3: memref<2x8x1xf32, #tpu.memory_space<vmem>>, %arg4: memref<8x32xf32, #tpu.memory_space<vmem>>, %arg5: memref<2x8x32xf32, #tpu.memory_space<vmem>>) attributes {dimension_semantics = [#tpu.dimension_semantics<parallel>, #tpu.dimension_semantics<parallel>, #tpu.dimension_semantics<parallel>], iteration_bounds = array<i64: 2, 1, 1>, scalar_prefetch = 0 : i64, scratch_operands = 0 : i64, tpu.core_type = #tpu.core_type<tc>, window_params = [{transform_indices = @transform_0, window_bounds = array<i64: 2, 8, 1>}, {transform_indices = @transform_1, window_bounds = array<i64: 8, 32>}, {transform_indices = @transform_2, window_bounds = array<i64: 2, 8, 32>}]} {
    %c0 = arith.constant 0 : index
    %c0_0 = arith.constant 0 : index
    %c0_1 = arith.constant 0 : index
    %0 = vector.load %arg3[%c0, %c0_0, %c0_1] : memref<2x8x1xf32, #tpu.memory_space<vmem>>, vector<2x8x1xf32>
    %c0_2 = arith.constant 0 : index
    %c0_3 = arith.constant 0 : index
    %1 = vector.load %arg4[%c0_2, %c0_3] : memref<8x32xf32, #tpu.memory_space<vmem>>, vector<8x32xf32>
    %2 = vector.shape_cast %1 : vector<8x32xf32> to vector<1x8x32xf32>
    %3 = vector.broadcast %0 : vector<2x8x1xf32> to vector<2x8x32xf32>
    %4 = vector.broadcast %2 : vector<1x8x32xf32> to vector<2x8x32xf32>
    %5 = arith.mulf %3, %4 : vector<2x8x32xf32>
    %c0_4 = arith.constant 0 : index
    %c0_5 = arith.constant 0 : index
    %c0_6 = arith.constant 0 : index
    %6 = vector.load %arg5[%c0_4, %c0_5, %c0_6] : memref<2x8x32xf32, #tpu.memory_space<vmem>>, vector<2x8x32xf32>
    tpu.vector_store %arg5[%c0_4, %c0_5, %c0_6], %5 {strides = array<i32>} : memref<2x8x32xf32, #tpu.memory_space<vmem>>, vector<2x8x32xf32>,
    return
  }
  func.func @transform_0(%arg0: i32, %arg1: i32, %arg2: i32) -> (i32, i32, i32) {
    %c0_i32 = arith.constant 0 : i32
    %c0_i32_0 = arith.constant 0 : i32
    return %arg2, %arg0, %c0_i32 : i32, i32, i32
  }
  func.func @transform_1(%arg0: i32, %arg1: i32, %arg2: i32) -> (i32, i32) {
    %c0_i32 = arith.constant 0 : i32
    return %arg0, %arg1 : i32, i32
  }
  func.func @transform_2(%arg0: i32, %arg1: i32, %arg2: i32) -> (i32, i32, i32) {
    %c0_i32 = arith.constant 0 : i32
    return %arg2, %arg0, %arg1 : i32, i32, i32
  }
}

</mosaic_0001>

<bundles_post_ra>
// kernel: tpu_custom_call.1
= control target key start
LH: loop header
LB: loop body
LE: loop exit
PB: predicated region body
PF: predicated region fallthrough
CT: control target
= control target key end

     0   :  { %7 = vsyncpa [#allocation4], 0  ;;  %s671_s0 = inlined_call_operand.vmem [shape: f32[2,16,1], index: 0, kind: input, shape index: {}]   ;;  %s672_s1 = inlined_call_operand.vmem [shape: f32[16,32], index: 1, kind: input, shape index: {}]   ;;  %s673_s2 = inlined_call_operand.hbm [shape: f32[2,16,32], index: 2, kind: output, shape index: {}]  }
   0x1   :  { %9 = vsyncpa [#allocation4 + $0x1], 0  ;;  %s546_s9 = smov 0   ;;  %s548_s10 = smov 0  }
   0x2   :  { %s550_s11 = smov 0   ;;  %s552_s12 = smov 0  }
   0x3   :  { %s554_s13 = smov 0   ;;  %s556_s14 = smov 0  }
   0x4 LB: > { %s372_s15 = sadd.s32 4294967295, %s524_s14   ;;  %s373_s16 = sadd.s32 4294967294, %s524_s14   ;;  %s524_s14 = sphi %s556_s14, %s15_s14   ;;  %s520_s13 = sphi %s554_s13, %s680_s13   ;;  %s516_s12 = sphi %s552_s12, %s679_s12   ;;  %s512_s11 = sphi %s550_s11, %s678_s11   ;;  %s508_s10 = sphi %s548_s10, %s677_s10   ;;  %s504_s9 = sphi %s546_s9, %s676_s9  }
   0x5   : > { %s34_s17 = sadd.s32 1, %s520_s13  ;;  %s43_s18 = sadd.s32 1, %s512_s11 }
   0x6   : > { %p36_p0 = scmp.ge.s32.totalorder %s34_s17, 2  ;;  %p50_p1 = scmp.ne.s32.totalorder %s512_s11, %s508_s10 }
   0x7   : > { %p51_p2 = scmp.eq.s32.totalorder %s524_s14, 0  ;;  %p112_p3 = scmp.eq.s32.totalorder %s372_s15, 1 }
   0x8   : > { %s682_s17 = smov (%p36_p0, %s34_s17), 0  ;;  %p117_p6 = scmp.ne.s32.totalorder %s508_s10, %s504_s9 }
   0x9   : > { %p52_p4 = por %p51_p2, %p50_p1  ;;  %p585_p5 = por %p112_p3, %p50_p1 }
   0xa   : > { %s39_s20 = ssub.s32 %s520_s13, %s682_s17  ;;  %p118_p8 = scmp.eq.s32.totalorder %s373_s16, 1 }
   0xb   : > { %p41_p7 = scmp.eq.s32.totalorder %s39_s20, 0  ;;  %p375_p10 = scmp.ge.s32.totalorder %s524_s14, 2 }
   0xc   : > { %p596_p9 = por %p118_p8, %p117_p6 }
   0xd   : > { %s594_s21 = scalar_select %p41_p7, %s512_s11, %s43_s18  }
   0xe   : > { %134 = sbr.rel (%p375_p10) target bundleno = 28 (0x1c), region = 16 }
  0x15   : > { %137 = sbr.rel (!%p52_p4) target bundleno = 28 (0x1c), region = 20  ;;  %s139_s23 = sand.u32 (%p52_p4), 1, %s512_s11  }
  0x16   : > { %s377_s24 = sshll.u32 (%p52_p4), %s520_s13, 3  ;;  %s376_s25 = sshll.u32 (%p52_p4), %s139_s23, 4 }
  0x17   : > { %s146_s28 = scalar_lea.vmem (%p52_p4), %s671_s0, %s377_s24  ;;  %s141_s29 = scalar_lea.vmem (%p52_p4), [#allocation2], %s376_s25 }
  0x18   : > { %v176_v0 = vld [vmem:[%s146_s28] sm:$0xff] (%p52_p4)  ;;  %v178_v1 = vld [vmem:[%s146_s28 + $0x10] sm:$0xff] (%p52_p4) }
  0x19   : > { %177 = vst [vmem:[%s141_s29] sm:$0xff] (%p52_p4), %v176_v0  ;;  %179 = vst [vmem:[%s141_s29 + $0x8] sm:$0xff] (%p52_p4), %v178_v1 }
  0x1c PF: > { %p378_p11 = scmp.ge.s32.totalorder %s524_s14, 1  ;;  %p194_p12 = scmp.lt.s32.totalorder %s524_s14, 3 }
  0x1e   : > { %p195_p13 = pnand %p378_p11, %p194_p12 }
  0x1f   : > { %s201_s30 = sand.u32 (!%p195_p13), 1, %s508_s10   ;;  %v526_v2 = vmov (!%p195_p13), 0   ;;  %p230_p0 = scmp.lt.s32.totalorder (!%p195_p13), %s516_s12, 1  ;;  %vm253_vm0 = vcmask (!%p195_p13), 261120  }
  0x20   : > { %198 = sbr.rel (%p195_p13) target bundleno = 185 (0xb9), region = 62  ;;  %445 = vset.pattern.permute.xlu0 (!%p195_p13), %v526_v2  ;;  %s379_s3 = sshll.u32 (!%p195_p13), %s201_s30, 4 }
  0x21   : > { %s203_s4 = scalar_lea.vmem (!%p195_p13), [#allocation2], %s379_s3  ;;  %s228_s16 = scalar_lea.vmem (!%p195_p13), [#allocation3], %s379_s3 }
  0x22   : > { %v238_v3 = vld [vmem:[%s203_s4] sm:$0xff] (!%p195_p13)  ;;  %v239_v4 = vld [vmem:[%s203_s4 + $0x8] sm:$0xff] (!%p195_p13)  ;;  %s273_s18 = sshll.u32 (!%p195_p13), %s228_s16, 4  ;;  %s383_s20 = sshll.u32 (!%p195_p13), %s516_s12, 7  ;;  %s617_s18 = int_to_ptr.vmem [resolvable:$true] %s273_s18 }
  0x23   : > { %243 = vperm.xlu0 (!%p195_p13), %445, %v238_v3   ;;  %s622_s25 = scalar_lea.hbm (!%p195_p13), %s673_s2, %s383_s20  ;;  %s624_s26 = scalar_lea.sflag (!%p195_p13), [#allocation4], %s201_s30 }
  0x24   : > { %s446_s27 = scalar_lea.vmem (!%p195_p13), %s617_s18, 256 }
  0x25   : > { %p447_p1 = scmp.ne.s32.totalorder (!%p195_p13), %s617_s18, %s446_s27 }
  0x27   : > { %248 = vperm.xlu0 %445, %v239_v4   ;;  %s231_s5 = scalar_select %p230_p0, %s516_s12, 1 }
  0x28   : > { %p448_p2 = pnand %p447_p1, %p585_p5  ;;  %s527_s12 = smov [#allocation3]  }
  0x29   : > { %s381_s6 = sshll.u32 %s231_s5, 3  ;;  %s450_s28 = sshll.u32 %s527_s12, 4  ;;  %s451_s28 = int_to_ptr.vmem [resolvable:$false] %s450_s28 }
  0x2a   : > { %s236_s15 = scalar_lea.vmem %s672_s1, %s381_s6  ;;  %p449_p3 = pneg %p448_p2 }
  0x2b   : > { %v240_v5 = vld [vmem:[%s236_s15] sm:$0xff]  ;;  %s452_s29 = scalar_lea.vmem %s451_s28, 512  ;;  %p453_p4 = scmp.lt.s32.totalorder %s617_s18, %s451_s28 }
  0x2c   : > { %p454_p6 = scmp.lt.s32.totalorder %s452_s29, %s446_s27 }
  0x2e   : > { %p455_p7 = por %p454_p6, %p453_p4 }
  0x30   : > { %p456_p8 = pnand %p455_p7, %p449_p3 }
  0xa2   : > { %v244_v6 = vpop.permute.xlu0 %243 }
  0xa3   : > { %v251_v7 = vmul.f32 %v244_v6, %v240_v5 }
  0xa5   : > { %254 = vst.msk [vmem:[%s228_s16] sm:$0xff] %vm253_vm0, %v251_v7 }
  0xa6   : > { %v249_v8 = vpop.permute.xlu0 %248 }
  0xa7   : > { %v252_v9 = vmul.f32 %v249_v8, %v240_v5 }
  0xa9   : > { %255 = vst.msk [vmem:[%s228_s16 + $0x8] sm:$0xff] %vm253_vm0, %v252_v9 }
  0xaa   : > { %459 = shalt.err (!%p456_p8)
}
  0xab   : > { %s460_s30 = scalar_lea.hbm %s622_s25, 256  ;;  %s464_s5 = scalar_lea.hbm %s673_s2, 512 }
  0xac   : > { %p461_p11 = scmp.ne.s32.totalorder %s622_s25, %s460_s30  ;;  %p465_p0 = scmp.lt.u32.totalorder %s622_s25, %s673_s2 }
  0xad   : > { %p466_p1 = scmp.lt.u32.totalorder %s464_s5, %s460_s30  ;;  %p468_p3 = scmp.lt.u32.totalorder %s460_s30, %s622_s25 }
  0xae   : > { %p462_p12 = pnand %p461_p11, %p585_p5 }
  0xaf   : > { %p467_p2 = por %p466_p1, %p465_p0 }
  0xb0   : > { %p463_p13 = pneg %p462_p12 }
  0xb1   : > { %p469_p4 = por %p468_p3, %p467_p2 }
  0xb3   : > { %p470_p6 = pnand %p469_p4, %p463_p13 }
  0xb5   : > { %473 = shalt.err (!%p470_p6)
}
  0xb6   : > { %s528_s8 = smov 128   ;;  %s529_s15 = smov 256  }
  0xb7   : > { %s530_s16 = smov 8  }
  0xb8   : > { %386 = dma.vmem_to_hbm [thread:$0]  (%p585_p5), %s617_s18, 256, %s622_s25, %s624_s26, %s528_s8, %s529_s15, %s530_s16  }
  0xb9 PF: > { %s288_s20 = sand.u32 1, %s504_s9   ;;  %p389_p7 = pnand %p375_p10, %p596_p9 }
  0xba   : > { %s289_s23 = scalar_lea.sflag [#allocation4], %s288_s20 }
  0xbb   : > { %499 = dma.done.wait (!%p389_p7), %s289_s23, 256  }
  0xbc   : > { %501 = vsyncadd (!%p389_p7), %s289_s23, 4294967040  ;;  %s15_s14 = sadd.s32 1, %s524_s14   ;;  %s676_s9 = smov %s508_s10 }
  0xbd   : > { %p12_p8 = scmp.ge.s32.totalorder %s15_s14, 4   ;;  %s677_s10 = smov %s512_s11 }
  0xbe   : > { %s678_s11 = smov %s594_s21  ;;  %s679_s12 = smov %s520_s13 }
  0xbf   : > { %s680_s13 = smov %s682_s17  ;;  %14 = sbr.rel (!%p12_p8) target bundleno = 4 (0x4), region = 109 }
  0xc6   :  { %294 = vsyncpa [#allocation4], 1 }
  0xc7   :  { %296 = vsyncpa [#allocation4 + $0x1], 1 }

</bundles_post_ra>
